<compile_context>
chip_gen: v5e
topology: v5e:2x2
jax: 0.10.0
libtpu: 0.0.40
codegen_flags: <defaults>
</compile_context>

<pallas_src>
import functools

import jax
import jax.numpy as jnp
from jax import lax
from jax.experimental import pallas as pl
from jax.experimental.pallas import tpu as pltpu


# ---------------------------------------------------------------------------
# One-time probe: pin down pltpu.roll's rotation direction convention.
# ---------------------------------------------------------------------------

@functools.lru_cache(maxsize=None)
def _roll_matches_numpy() -> bool:
    """True iff pltpu.roll(x, 1, axis=0)[i] == x[i - 1] (np.roll convention)."""
    def kernel(x_ref, o_ref):
        o_ref[...] = pltpu.roll(x_ref[...], 1, 0)

    x = jnp.arange(8 * 128, dtype=jnp.float32).reshape(8, 128)
    y = pl.pallas_call(
        kernel, out_shape=jax.ShapeDtypeStruct((8, 128), jnp.float32))(x)
    return bool(jnp.all(y[1:] == x[:-1]))


# ---------------------------------------------------------------------------
# Parameter prep (host side, call once -- the weights are static)
# ---------------------------------------------------------------------------

def prepare_params(params, W):
    """Fold module parameters into kernel-ready operands.

    Returns dict with:
      wb1, wb2 : (3*W*C, W*C) bf16 banded conv weights (rows ordered dy = 0, 1, 2)
      aux      : (4 + 2*Cr, W*C) f32 packed rows
                 [s1, b1, s2, b2, fc2 (Cr rows, W-tiled), fc1^T (Cr rows, W-tiled)]
    """
    C = params["w1"].shape[2]
    Cr = params["fc1"].shape[1]
    WC = W * C

    # dx-selection tensor: sel[dx, jp, j] = 1 iff jp == j + dx - 1 (input column
    # feeding output column j) -- one einsum instead of 3*3*W update-slices.
    sel = jnp.stack([jnp.eye(W, k=1 - dx, dtype=jnp.float32) for dx in range(3)])

    def band(w_hwio):                                  # (3,3,C,C) -> (3*WC, WC)
        b = jnp.einsum("xpj,yxio->ypijo", sel, w_hwio.astype(jnp.float32))
        return b.reshape(3 * WC, WC).astype(jnp.bfloat16)

    tile_w = lambda a: jnp.tile(jnp.reshape(a, (-1, C)), (1, W))     # (rows, WC)
    aux = jnp.concatenate(
        [tile_w(params["s1"]), tile_w(params["b1"]),
         tile_w(params["s2"]), tile_w(params["b2"]),
         tile_w(params["fc2"]),            # rows 4 .. 4+Cr-1
         tile_w(params["fc1"].T)],         # rows 4+Cr .. 4+2*Cr-1
        axis=0).astype(jnp.float32)

    return {"wb1": band(params["w1"]), "wb2": band(params["w2"]), "aux": aux}


# ---------------------------------------------------------------------------
# Kernel
# ---------------------------------------------------------------------------

def _make_kernel(Nb, H, W, C, Cr, np_roll):
    WC = W * C
    M = Nb * H
    inv_hw = 1.0 / float(H * W)
    # Circular roll amounts for the two vertical conv taps.  Boundary rows are
    # masked, so the wrap-around never leaks across images.
    down_shift = 1 if np_roll else M - 1        # result[i] = v[i - 1]
    up_shift = M - 1 if np_roll else 1          # result[i] = v[i + 1]

    def kernel(x_ref, wb1_ref, wb2_ref, aux_ref, o_ref):
        xv = x_ref[...]                                   # (Nb, H, WC) f32
        xf = xv.reshape(M, WC)                            # tile-aligned flatten
        aux = aux_ref[...]                                # (4 + 2*Cr, WC) f32

        # Per-row masks implementing the conv's vertical zero padding; rows are
        # (image, y) flattened, so image boundaries are masked as well.
        row = lax.broadcasted_iota(jnp.int32, (M, 1), 0) % H
        top_ok = row > 0                                  # row y-1 exists
        bot_ok = row < (H - 1)                            # row y+1 exists

        def conv3x3(v, wb_ref):
            """Padded 3x3 conv as one K = 3*WC MXU contraction.

            The three dy taps (row above / same / below) are built with sublane
            rolls + masks and concatenated along lanes, then contracted against
            the banded weight that folds the dx taps + channel contraction.
            """
            dn = jnp.where(top_ok, pltpu.roll(v, down_shift, 0), 0.0)
            up = jnp.where(bot_ok, pltpu.roll(v, up_shift, 0), 0.0)
            lhs = jnp.concatenate([dn, v, up], axis=1).astype(jnp.bfloat16)
            return jnp.dot(lhs, wb_ref[...],
                           preferred_element_type=jnp.float32)   # (M, WC) f32

        # conv1 -> bn1 (folded scale/shift) -> relu
        out1 = jnp.maximum(conv3x3(xf, wb1_ref) * aux[0:1, :] + aux[1:2, :], 0.0)

        # conv2 -> bn2 (folded scale/shift)
        out2 = conv3x3(out1, wb2_ref) * aux[2:3, :] + aux[3:4, :]    # (M, WC)
        out2_3d = out2.reshape(Nb, H, WC)

        # --- SE: global avg pool -> fc1 -> relu -> fc2 -> sigmoid ------------
        # Stays on VPU/XLU.  fc1/fc2 rows are W-tiled, so the W-fold of the pool
        # fuses into a full-lane reduction (no sub-vreg lane slices).
        rowsum = jnp.sum(out2_3d, axis=1)                 # (Nb, WC) sublane reduce
        logit = jnp.zeros((Nb, WC), jnp.float32)
        for r in range(Cr):      # Cr is tiny; each step = broadcast-mul + lane reduce
            fc1_r = aux[4 + Cr + r:5 + Cr + r, :]         # (1, WC)
            fc2_r = aux[4 + r:5 + r, :]                   # (1, WC)
            z_r = jnp.maximum(
                jnp.sum(rowsum * fc1_r, axis=1, keepdims=True) * inv_hw, 0.0)
            logit = logit + z_r * fc2_r
        se = jax.nn.sigmoid(logit)                        # (Nb, WC)

        # channel scale, residual add (downsample is None), final relu
        o_ref[...] = jnp.maximum(out2_3d * se[:, None, :] + xv, 0.0)

    return kernel


# ---------------------------------------------------------------------------
# Wrapper
# ---------------------------------------------------------------------------

def _pick_block_n(N, H):
    """Images per grid step: aim for M = Nb*H ~ 128 MXU rows while keeping >= 2
    grid steps when possible (v7x shares the 'parallel' axis across its 2 TCs)."""
    target = max(1, 128 // max(H, 1))
    divisors = [d for d in range(1, N + 1) if N % d == 0]
    pref = [d for d in divisors if d <= target and d < N]
    return max(pref) if pref else max(divisors)


def se_basic_block(x_nchw, prepared):
    """SEBasicBlock forward (stride=1, inplanes==planes, downsample=None, eval BN)."""
    return _se_basic_block_impl(x_nchw, prepared["wb1"], prepared["wb2"],
                                prepared["aux"], _roll_matches_numpy())


@functools.partial(jax.jit, static_argnums=(4,))
def _se_basic_block_impl(x_nchw, wb1, wb2, aux, np_roll):
    N, C, H, W = x_nchw.shape
    WC = W * C
    Cr = (aux.shape[0] - 4) // 2
    Nb = _pick_block_n(N, H)

    # Lane-dense activation layout (N, H, W*C); W*C is a multiple of 128 so every
    # kernel load/store is an unmasked full-lane access.
    x = jnp.transpose(x_nchw, (0, 2, 3, 1)).astype(jnp.float32).reshape(N, H, WC)

    # Grid-invariant operands (constant index maps) are fetched once, not per step.
    full = lambda shape: pl.BlockSpec(shape, lambda b: (0,) * len(shape))

    out = pl.pallas_call(
        _make_kernel(Nb, H, W, C, Cr, np_roll),
        out_shape=jax.ShapeDtypeStruct((N, H, WC), jnp.float32),
        grid=(N // Nb,),
        in_specs=[
            pl.BlockSpec((Nb, H, WC), lambda b: (b, 0, 0)),   # activations
            full(wb1.shape),                                  # fused banded conv1 weight
            full(wb2.shape),                                  # fused banded conv2 weight
            full(aux.shape),                                  # packed BN + SE fc rows
        ],
        out_specs=pl.BlockSpec((Nb, H, WC), lambda b: (b, 0, 0)),
        compiler_params=pltpu.CompilerParams(
            dimension_semantics=("parallel",)),               # batch axis -> megacore
    )(x, wb1, wb2, aux)

    return jnp.transpose(out.reshape(N, H, W, C), (0, 3, 1, 2))


# ---------------------------------------------------------------------------
# Pure-JAX reference (module semantics, f32, XLA convs) and param builder
# ---------------------------------------------------------------------------

def reference(x_nchw, params):
    x = jnp.transpose(x_nchw, (0, 2, 3, 1))

    def conv(inp, w):
        return lax.conv_general_dilated(
            inp, w, window_strides=(1, 1), padding="SAME",
            dimension_numbers=("NHWC", "HWIO", "NHWC"))

    out = conv(x, params["w1"]) * params["s1"] + params["b1"]
    out = jnp.maximum(out, 0.0)
    out = conv(out, params["w2"]) * params["s2"] + params["b2"]
    y = jnp.mean(out, axis=(1, 2))                        # (N, C)
    z = jnp.maximum(y @ params["fc1"], 0.0)
    s = jax.nn.sigmoid(z @ params["fc2"])                 # (N, C)
    out = out * s[:, None, None, :]
    out = jnp.maximum(out + x, 0.0)
    return jnp.transpose(out, (0, 3, 1, 2))


def make_params(key, channels, reduction=16, eps=1e-5):
    Cr = channels // reduction
    ks = jax.random.split(key, 12)
    w1 = 0.1 * jax.random.normal(ks[0], (3, 3, channels, channels), jnp.float32)
    w2 = 0.1 * jax.random.normal(ks[1], (3, 3, channels, channels), jnp.float32)

    def bn(kg, kb, km, kv):
        gamma = 1.0 + 0.1 * jax.random.normal(kg, (channels,), jnp.float32)
        beta = 0.1 * jax.random.normal(kb, (channels,), jnp.float32)
        mean = 0.1 * jax.random.normal(km, (channels,), jnp.float32)
        var = 1.0 + 0.1 * jnp.abs(jax.random.normal(kv, (channels,), jnp.float32))
        scale = gamma / jnp.sqrt(var + eps)
        shift = beta - mean * scale
        return scale.reshape(1, channels), shift.reshape(1, channels)

    s1, b1 = bn(ks[2], ks[3], ks[4], ks[5])
    s2, b2 = bn(ks[6], ks[7], ks[8], ks[9])
    fc1 = 0.2 * jax.random.normal(ks[10], (channels, Cr), jnp.float32)
    fc2 = 0.2 * jax.random.normal(ks[11], (Cr, channels), jnp.float32)
    return dict(w1=w1, w2=w2, s1=s1, b1=b1, s2=s2, b2=b2, fc1=fc1, fc2=fc2)


if __name__ == "__main__":
    # SEBasicBlock(inplanes=32, planes=32, stride=1, downsample=None, reduction=16).
    # N=32 so each of the 2 parallel grid steps runs M = 16*8 = 128 MXU rows.
    N, C, H, W = 32, 32, 8, 8
    key = jax.random.PRNGKey(0)
    kx, kp = jax.random.split(key)
    x = jax.random.normal(kx, (N, C, H, W), jnp.float32)
    params = make_params(kp, C, reduction=16)
    prepared = prepare_params(params, W)           # one-time weight folding (not jitted)

    out = jax.block_until_ready(se_basic_block(x, prepared))
    ref = jax.block_until_ready(reference(x, params))

    assert out.shape == (N, C, H, W)
    # bf16 MXU operands: tight aggregate check plus a bf16-sized element-wise bound.
    max_abs = float(jnp.max(jnp.abs(out - ref)))
    rel_l2 = float(jnp.linalg.norm(out - ref) / (jnp.linalg.norm(ref) + 1e-12))
    assert max_abs < 1e-1 and rel_l2 < 1e-2, (
        f"mismatch vs reference: max_abs={max_abs:.3e} rel_l2={rel_l2:.3e}")
    print("KERNEL_OK")
</pallas_src>

<mosaic_0001>
module attributes {stable_mosaic.version = 11 : i64} {
  func.func @kernel(%arg0: memref<8x128xf32, #tpu.memory_space<vmem>>, %arg1: memref<8x128xf32, #tpu.memory_space<vmem>>) attributes {dimension_semantics = [], scalar_prefetch = 0 : i64, scratch_operands = 0 : i64, tpu.core_type = #tpu.core_type<tc>} {
    %c0 = arith.constant 0 : index
    %c0_0 = arith.constant 0 : index
    %0 = vector.load %arg0[%c0, %c0_0] : memref<8x128xf32, #tpu.memory_space<vmem>>, vector<8x128xf32>
    %c1_i32 = arith.constant 1 : i32
    %1 = tpu.dynamic_rotate %0 by %c1_i32 dim 0 : vector<8x128xf32>, i32 -> vector<8x128xf32>
    %c0_1 = arith.constant 0 : index
    %c0_2 = arith.constant 0 : index
    %2 = vector.load %arg1[%c0_1, %c0_2] : memref<8x128xf32, #tpu.memory_space<vmem>>, vector<8x128xf32>
    tpu.vector_store %arg1[%c0_1, %c0_2], %1 {strides = array<i32>} : memref<8x128xf32, #tpu.memory_space<vmem>>, vector<8x128xf32>,
    return
  }
}

</mosaic_0001>

<bundles_post_ra>
// kernel: tpu_custom_call.1
= control target key start
LH: loop header
LB: loop body
LE: loop exit
PB: predicated region body
PF: predicated region fallthrough
CT: control target
= control target key end

     0   :  { %6 = vsyncpa [#allocation3], 0  ;;  %s115_s0 = inlined_call_operand.hbm [shape: f32[8,128], index: 0, kind: input, shape index: {}]   ;;  %s116_s1 = inlined_call_operand.hbm [shape: f32[8,128], index: 1, kind: output, shape index: {}]  }
   0x1   :  { %7 = vsyncpa [#allocation4], 0  ;;  %s13_s8 = sshll.u32 %s115_s0, 4  ;;  %s97_s9 = smov [#allocation2]   ;;  %s14_s8 = int_to_ptr.hbm [resolvable:$true] %s13_s8 }
   0x2   :  { %s15_s10 = sshll.u32 %s97_s9, 4  ;;  %s16_s10 = int_to_ptr.vmem [resolvable:$true] %s15_s10 }
   0x3   :  { %18 = dma.hbm_to_vmem [thread:$0]  %s14_s8, 128, %s16_s10, [#allocation3]  }
   0x4   :  { %93 = dma.done.wait [#allocation3], 128  }
   0x5   :  { %94 = vsyncadd [#allocation3], 4294967168  ;;  %s98_s11 = smov [#allocation5]   ;;  %s33_s15 = sshll.u32 %s116_s1, 4  ;;  %v23_v0 = vld [vmem:[#allocation2] sm:$0xff]  ;;  %s34_s15 = int_to_ptr.hbm [resolvable:$true] %s33_s15 }
   0x6   :  { %s31_s12 = sshll.u32 %s98_s11, 4  ;;  %v24_v1 = vrot.slane %v23_v0, 7  ;;  %s32_s12 = int_to_ptr.vmem [resolvable:$true] %s31_s12 }
   0x8   :  { %25 = vst [vmem:[#allocation5] sm:$0xff] %v24_v1 }
   0x9   :  { %36 = dma.vmem_to_hbm [thread:$0]  %s32_s12, 128, %s34_s15, [#allocation4]  }
   0xa   :  { %95 = dma.done.wait [#allocation4], 128  }
   0xb   :  { %96 = vsyncadd [#allocation4], 4294967168 }
   0xc   :  { %41 = vsyncpa [#allocation3], 1 }
   0xd   :  { %42 = vsyncpa [#allocation4], 1 }

</bundles_post_ra>
